<compile_context>
chip_gen: v5e
topology: v5e:2x2
jax: 0.10.0
libtpu: 0.0.40
codegen_flags: <defaults>
</compile_context>

<pallas_src>
import functools
import math

import jax
import jax.numpy as jnp
from jax import lax
from jax.experimental import pallas as pl
from jax.experimental.pallas import tpu as pltpu


def _round_up(x, m):
    return ((x + m - 1) // m) * m


def _anscombe_loss_kernel(pred_ref, targ_ref, out_ref, *, valid_rows, batch_tile, masked):
    # Upcast in-kernel so bf16/f16 inputs are accepted (compute stays f32; v5e has no
    # bf16 VPU/EUP path anyway).
    p = pred_ref[...].astype(jnp.float32)
    t = targ_ref[...].astype(jnp.float32)

    # Anscombe transforms (elementwise, VPU + EUP).
    a_t = 2.0 * jnp.sqrt(t + 0.375)                         # anscombe(targets)
    mu = 2.0 * jnp.sqrt(p + 0.375) - 0.25 * lax.rsqrt(p)     # anscombe(pred) - 1/(4*sqrt(pred))

    diff = a_t - mu
    # Per-element contribution; per-row constant term is added once in the wrapper.
    e = 0.5 * (diff * diff) + jnp.log(a_t)                   # (batch_tile, N)

    if masked:
        # Zero out rows past the true batch size (tail padding).
        row = pl.program_id(0) * batch_tile + lax.broadcasted_iota(jnp.int32, e.shape, 0)
        e = jnp.where(row < valid_rows, e, 0.0)

    # Reduce only over the batch/sublane axis; lane-dense (1, N) partial per block.
    out_ref[...] = jnp.sum(e, axis=0, keepdims=True)


def _vmem_capacity_bytes():
    try:
        return int(pltpu.get_tpu_info().vmem_capacity_bytes)
    except Exception:
        return 64 * 1024 * 1024  # conservative (v7x per-TC VMEM)


def _default_batch_tile(n_neurons, itemsize, batch_rows, vmem_cap):
    # 2 inputs x 2 pipeline buffers must fit comfortably inside scoped VMEM.
    tile_budget = vmem_cap // 8
    bt = tile_budget // (4 * n_neurons * itemsize)
    bt = max(8, min(int(bt), 1024))
    bt = (bt // 8) * 8
    # Never tile wider than the (8-rounded) batch.
    bt = min(bt, _round_up(batch_rows, 8))
    return max(bt, 8)


def anscombe_loss(predictions, targets, *, avg=False, batch_tile=None):
    """Pallas TPU implementation of AnscombeLoss.forward (per_neuron=False)."""
    assert predictions.shape == targets.shape
    assert predictions.ndim == 2
    B, N = predictions.shape
    itemsize = jnp.dtype(predictions.dtype).itemsize
    vmem_cap = _vmem_capacity_bytes()

    if batch_tile is None:
        batch_tile = _default_batch_tile(N, itemsize, B, vmem_cap)
    else:
        batch_tile = max(8, _round_up(int(batch_tile), 8))
        batch_tile = min(batch_tile, _round_up(B, 8))

    B_padded = _round_up(B, batch_tile)
    if B_padded != B:
        pad = B_padded - B
        # Pad with 1.0 (positive) so sqrt/log stay finite; padded rows are masked in-kernel.
        predictions = jnp.pad(predictions, ((0, pad), (0, 0)), constant_values=1.0)
        targets = jnp.pad(targets, ((0, pad), (0, 0)), constant_values=1.0)

    num_blocks = B_padded // batch_tile

    # VMEM: 2 inputs x 2 buffers x tile + double-buffered (1, N) output + slack.
    needed = 4 * batch_tile * N * itemsize + 2 * N * 4 + (2 << 20)
    vmem_limit = int(min(max(2 * needed, 32 << 20), (vmem_cap * 3) // 4))

    kernel = functools.partial(
        _anscombe_loss_kernel,
        valid_rows=B,
        batch_tile=batch_tile,
        masked=(B_padded != B),
    )

    partials = pl.pallas_call(
        kernel,
        out_shape=jax.ShapeDtypeStruct((num_blocks, N), jnp.float32),
        grid_spec=pltpu.PrefetchScalarGridSpec(
            num_scalar_prefetch=0,
            grid=(num_blocks,),
            in_specs=[
                pl.BlockSpec((batch_tile, N), lambda i: (i, 0)),
                pl.BlockSpec((batch_tile, N), lambda i: (i, 0)),
            ],
            out_specs=pl.BlockSpec((1, N), lambda i: (i, 0)),
        ),
        compiler_params=pltpu.CompilerParams(
            dimension_semantics=("parallel",),   # per-block outputs -> safe to shard across TCs
            vmem_limit_bytes=vmem_limit,
        ),
    )(predictions, targets)

    # Closed-form per-row constant, added once for all B (true, unpadded) rows.
    const = (N / 2.0) * math.log(2.0 * math.pi) - N * math.log(2.0)
    total = jnp.sum(partials) + jnp.float32(B * const)

    if avg:
        total = total / B
    return total
    # TODO(synk): per_neuron=True branch (per-sample aggregation) is not implemented
    # in-kernel; defaults (avg in {False, True}, per_neuron=False) are covered.


def _reference_anscombe_loss(predictions, targets, avg=False):
    """Pure-JAX reference mirroring the PyTorch forward exactly."""
    anscombe = lambda x: 2.0 * jnp.sqrt(x + 3.0 / 8.0)
    target = anscombe(targets)
    mu = anscombe(predictions) - 1.0 / (4.0 * jnp.sqrt(predictions))
    sse = jnp.sum((target - mu) ** 2, axis=1)
    n = target.shape[1]
    loss = -(
        -0.5 * sse
        - n / 2.0 * math.log(2.0 * math.pi)
        + n * math.log(2.0)
        - jnp.sum(jnp.log(target), axis=1)
    )
    return jnp.mean(loss) if avg else jnp.sum(loss)


if __name__ == "__main__":
    # Case 1: batch not a multiple of the tile (exercises padding + in-kernel masking).
    key = jax.random.PRNGKey(0)
    kp, kt = jax.random.split(key)
    B, N = 12, 256
    predictions = jax.random.uniform(kp, (B, N), dtype=jnp.float32, minval=0.1, maxval=5.0)
    targets = jax.random.uniform(kt, (B, N), dtype=jnp.float32, minval=0.1, maxval=5.0)

    result = anscombe_loss(predictions, targets)
    jax.block_until_ready(result)
    ref = _reference_anscombe_loss(predictions, targets)
    assert jnp.allclose(result, ref, rtol=1e-5, atol=1e-3), (result, ref)

    # Case 2: multiple grid blocks + tail block + avg=True, explicit small tile.
    kp2, kt2 = jax.random.split(jax.random.PRNGKey(1))
    B2, N2 = 20, 128
    p2 = jax.random.uniform(kp2, (B2, N2), dtype=jnp.float32, minval=0.1, maxval=5.0)
    t2 = jax.random.uniform(kt2, (B2, N2), dtype=jnp.float32, minval=0.1, maxval=5.0)

    result2 = anscombe_loss(p2, t2, avg=True, batch_tile=8)
    jax.block_until_ready(result2)
    ref2 = _reference_anscombe_loss(p2, t2, avg=True)
    assert jnp.allclose(result2, ref2, rtol=1e-5, atol=1e-3), (result2, ref2)

    print("KERNEL_OK")
</pallas_src>

<mosaic_0001>
module attributes {stable_mosaic.version = 11 : i64} {
  func.func @_anscombe_loss_kernel(%arg0: i32, %arg1: memref<16x256xf32, #tpu.memory_space<vmem>>, %arg2: memref<16x256xf32, #tpu.memory_space<vmem>>, %arg3: memref<1x256xf32, #tpu.memory_space<vmem>>) attributes {dimension_semantics = [#tpu.dimension_semantics<parallel>], iteration_bounds = array<i64: 1>, scalar_prefetch = 0 : i64, scratch_operands = 0 : i64, tpu.core_type = #tpu.core_type<tc>, window_params = [{transform_indices = @transform_0, window_bounds = array<i64: 16, 256>}, {transform_indices = @transform_1, window_bounds = array<i64: 16, 256>}, {transform_indices = @transform_2, window_bounds = array<i64: 1, 256>}]} {
    %c0 = arith.constant 0 : index
    %c0_0 = arith.constant 0 : index
    %0 = vector.load %arg1[%c0, %c0_0] : memref<16x256xf32, #tpu.memory_space<vmem>>, vector<16x256xf32>
    %c0_1 = arith.constant 0 : index
    %c0_2 = arith.constant 0 : index
    %1 = vector.load %arg2[%c0_1, %c0_2] : memref<16x256xf32, #tpu.memory_space<vmem>>, vector<16x256xf32>
    %cst = arith.constant 3.750000e-01 : f32
    %2 = vector.broadcast %cst : f32 to vector<16x256xf32>
    %3 = arith.addf %1, %2 : vector<16x256xf32>
    %4 = math.sqrt %3 : vector<16x256xf32>
    %cst_3 = arith.constant 2.000000e+00 : f32
    %5 = vector.broadcast %cst_3 : f32 to vector<16x256xf32>
    %6 = arith.mulf %5, %4 : vector<16x256xf32>
    %cst_4 = arith.constant 3.750000e-01 : f32
    %7 = vector.broadcast %cst_4 : f32 to vector<16x256xf32>
    %8 = arith.addf %0, %7 : vector<16x256xf32>
    %9 = math.sqrt %8 : vector<16x256xf32>
    %cst_5 = arith.constant 2.000000e+00 : f32
    %10 = vector.broadcast %cst_5 : f32 to vector<16x256xf32>
    %11 = arith.mulf %10, %9 : vector<16x256xf32>
    %12 = math.rsqrt %0 : vector<16x256xf32>
    %cst_6 = arith.constant 2.500000e-01 : f32
    %13 = vector.broadcast %cst_6 : f32 to vector<16x256xf32>
    %14 = arith.mulf %13, %12 : vector<16x256xf32>
    %15 = arith.subf %11, %14 : vector<16x256xf32>
    %16 = arith.subf %6, %15 : vector<16x256xf32>
    %17 = arith.mulf %16, %16 : vector<16x256xf32>
    %cst_7 = arith.constant 5.000000e-01 : f32
    %18 = vector.broadcast %cst_7 : f32 to vector<16x256xf32>
    %19 = arith.mulf %18, %17 : vector<16x256xf32>
    %20 = math.log %6 : vector<16x256xf32>
    %21 = arith.addf %19, %20 : vector<16x256xf32>
    %c16_i32 = arith.constant 16 : i32
    %22 = arith.muli %arg0, %c16_i32 : i32
    %23 = tpu.iota {dimensions = array<i32: 0>} : vector<16x256xi32>
    %24 = vector.broadcast %22 : i32 to vector<16x256xi32>
    %25 = arith.addi %24, %23 : vector<16x256xi32>
    %c12_i32 = arith.constant 12 : i32
    %26 = vector.broadcast %c12_i32 : i32 to vector<16x256xi32>
    %27 = arith.cmpi slt, %25, %26 : vector<16x256xi32>
    %cst_8 = arith.constant 0.000000e+00 : f32
    %28 = vector.broadcast %cst_8 : f32 to vector<16x256xf32>
    %29 = arith.select %27, %21, %28 : vector<16x256xi1>, vector<16x256xf32>
    %cst_9 = arith.constant dense<0.000000e+00> : vector<256xf32>
    %30 = vector.multi_reduction <add>, %29, %cst_9 [0] : vector<16x256xf32> to vector<256xf32>
    %31 = vector.shape_cast %30 : vector<256xf32> to vector<1x256xf32>
    %c0_10 = arith.constant 0 : index
    %c0_11 = arith.constant 0 : index
    %32 = vector.load %arg3[%c0_10, %c0_11] : memref<1x256xf32, #tpu.memory_space<vmem>>, vector<1x256xf32>
    tpu.vector_store %arg3[%c0_10, %c0_11], %31 {strides = array<i32>} : memref<1x256xf32, #tpu.memory_space<vmem>>, vector<1x256xf32>,
    return
  }
  func.func @transform_0(%arg0: i32) -> (i32, i32) {
    %c0_i32 = arith.constant 0 : i32
    %c0_i32_0 = arith.constant 0 : i32
    return %arg0, %c0_i32 : i32, i32
  }
  func.func @transform_1(%arg0: i32) -> (i32, i32) {
    %c0_i32 = arith.constant 0 : i32
    %c0_i32_0 = arith.constant 0 : i32
    return %arg0, %c0_i32 : i32, i32
  }
  func.func @transform_2(%arg0: i32) -> (i32, i32) {
    %c0_i32 = arith.constant 0 : i32
    %c0_i32_0 = arith.constant 0 : i32
    return %arg0, %c0_i32 : i32, i32
  }
}

</mosaic_0001>

<bundles_post_ra>
// kernel: tpu_custom_call.1
= control target key start
LH: loop header
LB: loop body
LE: loop exit
PB: predicated region body
PF: predicated region fallthrough
CT: control target
= control target key end

     0   :  { %7 = vsyncpa [#allocation3], 0  ;;  %s616_s0 = inlined_call_operand.hbm [shape: f32[16,256], index: 0, kind: input, shape index: {}]   ;;  %s617_s1 = inlined_call_operand.hbm [shape: f32[16,256], index: 1, kind: input, shape index: {}]   ;;  %s618_s2 = inlined_call_operand.hbm [shape: f32[1,256], index: 2, kind: output, shape index: {}]  }
   0x1   :  { %8 = vsyncpa [#allocation6], 0 }
   0x2   :  { %9 = vsyncpa [#allocation4], 0  ;;  %s14_s11 = sshll.u32 %s616_s0, 4  ;;  %s407_s12 = smov [#allocation2]   ;;  %s15_s11 = int_to_ptr.hbm [resolvable:$true] %s14_s11 }
   0x3   :  { %s16_s13 = sshll.u32 %s407_s12, 4  ;;  %s27_s16 = sshll.u32 %s617_s1, 4  ;;  %s17_s13 = int_to_ptr.vmem [resolvable:$true] %s16_s13  ;;  %s28_s16 = int_to_ptr.hbm [resolvable:$true] %s27_s16 }
   0x4   :  { %s408_s17 = smov 256   ;;  %s409_s18 = smov 16  }
   0x5   :  { %22 = dma.hbm_to_vmem [thread:$0]  %s15_s11, 512, %s17_s13, [#allocation3], %s408_s17, %s408_s17, %s409_s18  }
   0x6   :  { %s410_s19 = smov [#allocation5]  }
   0x7   :  { %s29_s20 = sshll.u32 %s410_s19, 4  ;;  %s30_s20 = int_to_ptr.vmem [resolvable:$true] %s29_s20 }
   0x8   :  { %35 = dma.hbm_to_vmem [thread:$0]  %s28_s16, 512, %s30_s20, [#allocation6], %s408_s17, %s408_s17, %s409_s18  }
   0x9   :  { %401 = dma.done.wait [#allocation3], 512  }
   0xa   :  { %402 = vsyncadd [#allocation3], 4294966784 }
   0xb   :  { %403 = dma.done.wait [#allocation6], 512  }
   0xc   :  { %404 = vsyncadd [#allocation6], 4294966784  ;;  %v433_v0 = vld [vmem:[#allocation2] sm:$0xff]  ;;  %v435_v1 = vld [vmem:[#allocation2 + $0x8] sm:$0xff]  ;;  %s411_s0 = smov [#allocation7]   ;;  %s281_s23 = sshll.u32 %s618_s2, 4  ;;  %s282_s23 = int_to_ptr.hbm [resolvable:$true] %s281_s23 }
   0xd   :  { %v48_v2 = vld [vmem:[#allocation5] sm:$0xff]  ;;  %v49_v3 = vld [vmem:[#allocation5 + $0x8] sm:$0xff]  ;;  %v438_v4 = vadd.f32 0.375, %v433_v0  ;;  %v440_v5 = vld [vmem:[#allocation2 + $0x10] sm:$0xff]  ;;  %v455_v13 = vadd.f32 0.375, %v435_v1  ;;  %vm170_vm12 = vweird.f32 %v433_v0  ;;  %vm180_vm14 = vweird.f32 %v435_v1  ;;  %s279_s1 = sshll.u32 %s411_s0, 4  ;;  %s280_s1 = int_to_ptr.vmem [resolvable:$true] %s279_s1 }
   0xe   :  { %v50_v6 = vld [vmem:[#allocation5 + $0x10] sm:$0xff]  ;;  %v51_v7 = vld [vmem:[#allocation5 + $0x18] sm:$0xff]  ;;  %v442_v8 = vadd.f32 0.375, %v48_v2  ;;  %v444_v9 = vadd.f32 0.375, %v49_v3  ;;  %v459_v14 = vadd.f32 0.375, %v440_v5 }
   0xf   :  { %v446_v10 = vld [vmem:[#allocation2 + $0x18] sm:$0xff]  ;;  %v448_v11 = vadd.f32 0.375, %v50_v6  ;;  %v450_v12 = vadd.f32 0.375, %v51_v7  ;;  %297 = vrsqrt.f32 %v438_v4  ;;  %vm119_vm1 = vcmp.eq.f32.partialorder %v438_v4, inf }
  0x10   :  { %299 = vrsqrt.f32 %v442_v8  ;;  %v463_v15 = vadd.f32 0.375, %v446_v10  ;;  %v66_v45 = vand.u32 2147483648, %v442_v8  ;;  %vm63_vm0 = vcmp.eq.f32.partialorder %v442_v8, inf }
  0x11   :  { %301 = vrsqrt.f32 %v444_v9  ;;  %vm75_vm2 = vcmp.eq.f32.partialorder %v444_v9, inf  ;;  %v78_v55 = vand.u32 2147483648, %v444_v9  ;;  %vm87_vm3 = vcmp.eq.f32.partialorder %v448_v11, inf }
  0x12   :  { %303 = vrsqrt.f32 %v448_v11  ;;  %v90_v58 = vand.u32 2147483648, %v448_v11  ;;  %vm99_vm4 = vcmp.eq.f32.partialorder %v450_v12, inf  ;;  %v102_v59 = vand.u32 2147483648, %v450_v12 }
  0x13   :  { %305 = vrsqrt.f32 %v450_v12  ;;  %vm65_vm5 = vcmp.eq.f32.partialorder %v442_v8, 0.0  ;;  %vm77_vm6 = vcmp.eq.f32.partialorder %v444_v9, 0.0  ;;  %vm121_vm9 = vcmp.eq.f32.partialorder %v438_v4, 0.0 }
  0x14   :  { %307 = vrsqrt.f32 %v455_v13  ;;  %vm131_vm10 = vcmp.eq.f32.partialorder %v455_v13, inf  ;;  %vm133_vm11 = vcmp.eq.f32.partialorder %v455_v13, 0.0  ;;  %vm143_vm8 = vcmp.eq.f32.partialorder %v459_v14, inf }
  0x15   :  { %v298_v16 = vpop.eup %297  ;;  %309 = vrsqrt.f32 %v459_v14 }
  0x16   :  { %v300_v17 = vpop.eup %299  ;;  %v113_v18 = vmul.f32 %v298_v16, %v438_v4  ;;  %311 = vrsqrt.f32 %v463_v15 }
  0x17   :  { %v302_v19 = vpop.eup %301  ;;  %v57_v20 = vmul.f32 %v300_v17, %v442_v8  ;;  %313 = vrsqrt.f32 %v433_v0 }
  0x18   :  { %v304_v21 = vpop.eup %303  ;;  %v69_v22 = vmul.f32 %v302_v19, %v444_v9  ;;  %v114_v23 = vmul.f32 %v298_v16, %v113_v18  ;;  %315 = vrsqrt.f32 %v435_v1 }
  0x19   :  { %v306_v24 = vpop.eup %305  ;;  %v58_v25 = vmul.f32 %v300_v17, %v57_v20  ;;  %v81_v26 = vmul.f32 %v304_v21, %v448_v11  ;;  %317 = vrsqrt.f32 %v440_v5 }
  0x1a   :  { %v308_v27 = vpop.eup %307  ;;  %v70_v28 = vmul.f32 %v302_v19, %v69_v22  ;;  %v93_v29 = vmul.f32 %v306_v24, %v450_v12  ;;  %v115_v32 = vmul.f32 0.5, %v114_v23  ;;  %319 = vrsqrt.f32 %v446_v10 }
  0x1b   :  { %v476_v30 = vpop.eup %309  ;;  %v82_v31 = vmul.f32 %v304_v21, %v81_v26  ;;  %v125_v33 = vmul.f32 %v308_v27, %v455_v13  ;;  %v59_v35 = vmul.f32 0.5, %v58_v25 }
  0x1c   :  { %v479_v34 = vpop.eup %311  ;;  %v71_v36 = vmul.f32 0.5, %v70_v28  ;;  %v94_v37 = vmul.f32 %v306_v24, %v93_v29  ;;  %v137_v38 = vmul.f32 %v476_v30, %v459_v14  ;;  %v116_v49 = vsub.f32 1.5, %v115_v32 }
  0x1d   :  { %v83_v39 = vmul.f32 0.5, %v82_v31  ;;  %v126_v40 = vmul.f32 %v308_v27, %v125_v33  ;;  %v483_v41 = vpop.eup %313  ;;  %v149_v43 = vmul.f32 %v479_v34, %v463_v15  ;;  %v60_v47 = vsub.f32 1.5, %v59_v35 }
  0x1e   :  { %v95_v42 = vmul.f32 0.5, %v94_v37  ;;  %v487_v44 = vpop.eup %315  ;;  %v72_v48 = vsub.f32 1.5, %v71_v36  ;;  %v138_v50 = vmul.f32 %v476_v30, %v137_v38  ;;  %v165_v54 = vmul.f32 %v483_v41, %v433_v0 }
  0x1f   :  { %v127_v46 = vmul.f32 0.5, %v126_v40  ;;  %v84_v51 = vsub.f32 1.5, %v83_v39  ;;  %v150_v56 = vmul.f32 %v479_v34, %v149_v43  ;;  %v175_v57 = vmul.f32 %v487_v44, %v435_v1 }
  0x20   :  { %v96_v52 = vsub.f32 1.5, %v95_v42  ;;  %v61_v60 = vmul.f32 %v300_v17, %v60_v47  ;;  %v73_v61 = vmul.f32 %v302_v19, %v72_v48  ;;  %v117_v62 = vmul.f32 %v298_v16, %v116_v49 }
  0x21   :  { %v128_v53 = vsub.f32 1.5, %v127_v46  ;;  %v139_v63 = vmul.f32 0.5, %v138_v50  ;;  %v85_v2 = vmul.f32 %v304_v21, %v84_v51  ;;  %v166_v7 = vmul.f32 %v483_v41, %v165_v54  ;;  %v318_v50 = vpop.eup %317 }
  0x22   :  { %v97_v3 = vmul.f32 %v306_v24, %v96_v52  ;;  %v122_v17 = vand.u32 2147483648, %v438_v4  ;;  %v151_v18 = vmul.f32 0.5, %v150_v56  ;;  %v176_v16 = vmul.f32 %v487_v44, %v175_v57  ;;  %v320_v51 = vpop.eup %319 }
  0x23   :  { %v129_v6 = vmul.f32 %v308_v27, %v128_v53  ;;  %vm171_vm13 = vweird.f32 %v483_v41  ;;  %v62_v19 = vmul.f32 %v61_v60, %v442_v8  ;;  %v74_v20 = vmul.f32 %v73_v61, %v444_v9 }
  0x24   :  { %v118_v21 = vmul.f32 %v117_v62, %v438_v4  ;;  %v140_v22 = vsub.f32 1.5, %v139_v63  ;;  %v86_v23 = vmul.f32 %v85_v2, %v448_v11  ;;  %v98_v24 = vmul.f32 %v97_v3, %v450_v12  ;;  %vm537_vm7 = vmor %vm170_vm12, %vm171_vm13 }
  0x25   :  { %v130_v25 = vmul.f32 %v129_v6, %v455_v13  ;;  %v167_v26 = vmul.f32 0.5, %v166_v7  ;;  %v152_v27 = vsub.f32 1.5, %v151_v18  ;;  %v177_v28 = vmul.f32 0.5, %v176_v16 }
  0x26   :  { %vm181_vm15 = vweird.f32 %v487_v44  ;;  %v134_v29 = vand.u32 2147483648, %v455_v13  ;;  %v64_v32 = vsel %vm63_vm0, %v442_v8, %v62_v19  ;;  %v120_v33 = vsel %vm119_vm1, %v438_v4, %v118_v21 }
  0x27   :  { %v168_v31 = vsub.f32 1.5, %v167_v26  ;;  %v178_v36 = vsub.f32 1.5, %v177_v28  ;;  %v76_v37 = vsel %vm75_vm2, %v444_v9, %v74_v20  ;;  %v132_v38 = vsel %vm131_vm10, %v455_v13, %v130_v25  ;;  %vm555_vm1 = vmor %vm180_vm14, %vm181_vm15 }
  0x28   :  { %v141_v39 = vmul.f32 %v476_v30, %v140_v22  ;;  %vm145_vm0 = vcmp.eq.f32.partialorder %v459_v14, 0.0  ;;  %v88_v42 = vsel %vm87_vm3, %v448_v11, %v86_v23  ;;  %v100_v30 = vsel %vm99_vm4, %v450_v12, %v98_v24 }
  0x29   :  { %v169_v0 = vmul.f32 %v483_v41, %v168_v31  ;;  %v153_v43 = vmul.f32 %v479_v34, %v152_v27  ;;  %v179_v46 = vmul.f32 %v487_v44, %v178_v36  ;;  %v123_v47 = vsel %vm121_vm9, %v122_v17, %v120_v33 }
  0x2a   :  { %v146_v1 = vand.u32 2147483648, %v459_v14  ;;  %vm155_vm2 = vcmp.eq.f32.partialorder %v463_v15, inf  ;;  %v67_v49 = vsel %vm65_vm5, %v66_v45, %v64_v32  ;;  %v135_v34 = vsel %vm133_vm11, %v134_v29, %v132_v38 }
  0x2b   :  { %v173_v48 = vsel %vm537_vm7, %v483_v41, %v169_v0  ;;  %vm157_vm3 = vcmp.eq.f32.partialorder %v463_v15, 0.0  ;;  %v183_v4 = vsel %vm555_vm1, %v487_v44, %v179_v46  ;;  %v79_v41 = vsel %vm77_vm6, %v78_v55, %v76_v37 }
  0x2c   :  { %vm623_vm4 = vcmp.eq.f32.partialorder %v448_v11, 0.0  ;;  %vm624_vm5 = vcmp.eq.f32.partialorder %v450_v12, 0.0  ;;  %v142_v45 = vmul.f32 %v141_v39, %v459_v14  ;;  %v154_v44 = vmul.f32 %v153_v43, %v463_v15 }
  0x2d   :  { %v91_v8 = vsel %vm623_vm4, %v90_v58, %v88_v42  ;;  %v103_v13 = vsel %vm624_vm5, %v102_v59, %v100_v30  ;;  %v160_v52 = vmul.f32 2.0, %v123_v47  ;;  %v185_v53 = vmul.f32 %v318_v50, %v440_v5 }
  0x2e   :  { %v204_v9 = vmul.f32 0.25, %v173_v48  ;;  %v158_v54 = vand.u32 2147483648, %v463_v15  ;;  %v161_v55 = vmul.f32 2.0, %v135_v34  ;;  %v195_v11 = vmul.f32 %v320_v51, %v446_v10 }
  0x2f   :  { %v205_v56 = vmul.f32 0.25, %v183_v4  ;;  %v104_v57 = vmul.f32 2.0, %v67_v49  ;;  %v105_v58 = vmul.f32 2.0, %v79_v41  ;;  %v106_v60 = vmul.f32 2.0, %v91_v8 }
  0x30   :  { %v186_v12 = vmul.f32 %v318_v50, %v185_v53  ;;  %v107_v59 = vmul.f32 2.0, %v103_v13  ;;  %v144_v61 = vsel %vm143_vm8, %v459_v14, %v142_v45  ;;  %vm190_vm6 = vweird.f32 %v440_v5 }
  0x31   :  { %v196_v62 = vmul.f32 %v320_v51, %v195_v11  ;;  %v156_v63 = vsel %vm155_vm2, %v463_v15, %v154_v44  ;;  %vm191_vm7 = vweird.f32 %v318_v50  ;;  %v208_v3 = vsub.f32 %v160_v52, %v204_v9 }
  0x32   :  { %v187_v2 = vmul.f32 0.5, %v186_v12  ;;  %vm200_vm9 = vweird.f32 %v446_v10  ;;  %vm201_vm10 = vweird.f32 %v320_v51  ;;  %v209_v7 = vsub.f32 %v161_v55, %v205_v56  ;;  %vm192_vm8 = vmor %vm190_vm6, %vm191_vm7 }
  0x33   :  { %v197_v6 = vmul.f32 0.5, %v196_v62  ;;  %v147_v17 = vsel %vm145_vm0, %v146_v1, %v144_v61  ;;  %321 = vlog2.f32 %v104_v57  ;;  %v159_v5 = vsel %vm157_vm3, %v158_v54, %v156_v63  ;;  %vm202_vm11 = vmor %vm200_vm9, %vm201_vm10 }
  0x34   :  { %v188_v18 = vsub.f32 1.5, %v187_v2  ;;  %323 = vlog2.f32 %v105_v58  ;;  %v212_v20 = vsub.f32 %v104_v57, %v208_v3  ;;  %v237_v21 = vlaneseq }
  0x35   :  { %v198_v16 = vsub.f32 1.5, %v197_v6  ;;  %325 = vlog2.f32 %v106_v60  ;;  %v162_v22 = vmul.f32 2.0, %v147_v17  ;;  %v213_v23 = vsub.f32 %v105_v58, %v209_v7 }
  0x36   :  { %v189_v19 = vmul.f32 %v318_v50, %v188_v18  ;;  %327 = vlog2.f32 %v107_v59  ;;  %v163_v24 = vmul.f32 2.0, %v159_v5  ;;  %v216_v15 = vmul.f32 %v212_v20, %v212_v20 }
  0x37   :  { %v199_v10 = vmul.f32 %v320_v51, %v198_v16  ;;  %v238_v29 = vshrl.u32 %v237_v21, 7  ;;  %v217_v33 = vmul.f32 %v213_v23, %v213_v23  ;;  %vm266_vm13 = vcmask 1040384  }
  0x38   :  { %v193_v14 = vsel %vm192_vm8, %v318_v50, %v189_v19  ;;  %v220_v0 = vmul.f32 0.5, %v216_v15  ;;  %vm271_vm14 = vcmp.lt.s32.totalorder %v237_v21, 256 }
  0x39   :  { %v203_v25 = vsel %vm202_vm11, %v320_v51, %v199_v10  ;;  %v206_v26 = vmul.f32 0.25, %v193_v14  ;;  %v322_v27 = vpop.eup %321  ;;  %v239_v42 = vadd.s32 8, %v238_v29  ;;  %v221_v43 = vmul.f32 0.5, %v217_v33 }
  0x3a   :  { %v207_v28 = vmul.f32 0.25, %v203_v25  ;;  %v324_v31 = vpop.eup %323  ;;  %v225_v40 = vmul.f32 0.6931472, %v322_v27 }
  0x3b   :  { %v210_v32 = vsub.f32 %v162_v22, %v206_v26  ;;  %v326_v35 = vpop.eup %325  ;;  %v227_v46 = vmul.f32 0.6931472, %v324_v31  ;;  %vm244_vm12 = vcmp.lt.s32.totalorder %v239_v42, 12 }
  0x3c   :  { %v211_v36 = vsub.f32 %v163_v24, %v207_v28  ;;  %v328_v37 = vpop.eup %327  ;;  %v229_v47 = vmul.f32 0.6931472, %v326_v35  ;;  %v232_v4 = vadd.f32 %v225_v40, %v220_v0 }
  0x3d   :  { %v214_v38 = vsub.f32 %v106_v60, %v210_v32  ;;  %v231_v48 = vmul.f32 0.6931472, %v328_v37  ;;  %v233_v50 = vadd.f32 %v227_v46, %v221_v43 }
  0x3e   :  { %v215_v39 = vsub.f32 %v107_v59, %v211_v36 }
  0x3f   :  { %v218_v30 = vmul.f32 %v214_v38, %v214_v38 }
  0x40   :  { %v219_v1 = vmul.f32 %v215_v39, %v215_v39 }
  0x41   :  { %v222_v49 = vmul.f32 0.5, %v218_v30 }
  0x42   :  { %v223_v34 = vmul.f32 0.5, %v219_v1 }
  0x43   :  { %v234_v41 = vadd.f32 %v229_v47, %v222_v49 }
  0x44   :  { %v235_v8 = vadd.f32 %v231_v48, %v223_v34 }
  0x45   :  { %v247_v13 = vsel %vm244_vm12, %v234_v41, 0.0 }
  0x46   :  { %v248_v45 = vsel %vm244_vm12, %v235_v8, 0.0  ;;  %v249_v51 = vadd.f32 %v247_v13, %v232_v4 }
  0x47   :  { %v256_v44 = vadd.f32 %v248_v45, %v233_v50 }
  0x48   :  { %v250_v52 = vrot.slane %v249_v51, 4 }
  0x49   :  { %v257_v53 = vrot.slane %v256_v44, 4 }
  0x4a   :  { %v251_v9 = vadd.f32 %v250_v52, %v249_v51 }
  0x4b   :  { %v258_v54 = vadd.f32 %v257_v53, %v256_v44 }
  0x4c   :  { %v252_v55 = vrot.slane %v251_v9, 2 }
  0x4d   :  { %v259_v11 = vrot.slane %v258_v54, 2 }
  0x4e   :  { %v253_v56 = vadd.f32 %v252_v55, %v251_v9 }
  0x4f   :  { %v260_v57 = vadd.f32 %v259_v11, %v258_v54 }
  0x50   :  { %v254_v58 = vrot.slane %v253_v56, 1 }
  0x51   :  { %v261_v60 = vrot.slane %v260_v57, 1 }
  0x52   :  { %v255_v12 = vadd.f32 %v254_v58, %v253_v56 }
  0x53   :  { %v262_v59 = vadd.f32 %v261_v60, %v260_v57 }
  0x55   :  { %v265_v61 = vrot.slane %v262_v59, 7 }
  0x57   :  { %v267_v62 = vsel %vm266_vm13, %v255_v12, %v265_v61 }
  0x58   :  { %273 = vst.msk [vmem:[#allocation7] sm:$0x3] %vm271_vm14, %v267_v62 }
  0x59   :  { %284 = dma.vmem_to_hbm [thread:$0]  %s280_s1, 32, %s282_s23, [#allocation4]  }
  0x5a   :  { %405 = dma.done.wait [#allocation4], 32  }
  0x5b   :  { %406 = vsyncadd [#allocation4], 4294967264 }
  0x5c   :  { %289 = vsyncpa [#allocation3], 1 }
  0x5d   :  { %290 = vsyncpa [#allocation6], 1 }
  0x5e   :  { %291 = vsyncpa [#allocation4], 1 }

</bundles_post_ra>
